<compile_context>
chip_gen: v5e
topology: v5e:2x2
jax: 0.10.0
libtpu: 0.0.40
codegen_flags: <defaults>
</compile_context>

<pallas_src>
import functools

import numpy as np
import jax
import jax.numpy as jnp
from jax import lax
from jax.experimental import pallas as pl
from jax.experimental.pallas import tpu as pltpu


def _clip_loss_kernel(scale_ref,                 # SMEM (1,1) f32: exp(logit_scale)
                      img_ref, txt_ref,          # VMEM feature tiles
                      out_ref,                   # VMEM (1,1) f32 accumulator
                      m_row, l_row,              # VMEM (TM,1) f32 row LSE state
                      col_m, col_s,              # VMEM (NJ,1,TN) f32 col LSE state
                      *, inv_b, tm, tn):
    i = pl.program_id(0)                         # row tile
    j = pl.program_id(1)                         # column tile (inner axis)
    ni = pl.num_programs(0)
    nj = pl.num_programs(1)

    @pl.when(jnp.logical_and(i == 0, j == 0))
    def _():
        out_ref[...] = jnp.zeros_like(out_ref)

    @pl.when(j == 0)
    def _():
        m_row[...] = jnp.full_like(m_row, -jnp.inf)
        l_row[...] = jnp.zeros_like(l_row)

    @pl.when(i == 0)
    def _():
        col_m[j] = jnp.full(col_m.shape[1:], -jnp.inf, dtype=col_m.dtype)
        col_s[j] = jnp.zeros(col_s.shape[1:], dtype=col_s.dtype)

    # logits tile: contract on the last (feature/lane) axis of both operands —
    # no explicit transpose of the text block; scale applied to the f32 result.
    logits = lax.dot_general(
        img_ref[...], txt_ref[...],
        dimension_numbers=(((1,), (1,)), ((), ())),
        preferred_element_type=jnp.float32) * scale_ref[0, 0]   # (TM, TN) f32

    # ---- online row logsumexp (image -> text cross entropy) ----
    m_prev = m_row[...]
    m_new = jnp.maximum(m_prev, jnp.max(logits, axis=1, keepdims=True))
    l_row[...] = (l_row[...] * jnp.exp(m_prev - m_new)
                  + jnp.sum(jnp.exp(logits - m_new), axis=1, keepdims=True))
    m_row[...] = m_new

    # ---- online column logsumexp (text -> image cross entropy),
    #      accumulated across row tiles in persistent scratch ----
    cm_prev = col_m[j]
    cs_prev = col_s[j]
    cm_new = jnp.maximum(cm_prev, jnp.max(logits, axis=0, keepdims=True))
    col_s[j] = (cs_prev * jnp.exp(cm_prev - cm_new)
                + jnp.sum(jnp.exp(logits - cm_new), axis=0, keepdims=True))
    col_m[j] = cm_new

    # ---- diagonal ("correct pair") logits: only tiles straddling the
    #      diagonal pay for the iota mask; reused by both CE terms (factor 2).
    row0 = i * tm
    col0 = j * tn

    @pl.when(jnp.logical_and(row0 < col0 + tn, col0 < row0 + tm))
    def _():
        rg = row0 + lax.broadcasted_iota(jnp.int32, (tm, tn), 0)
        cg = col0 + lax.broadcasted_iota(jnp.int32, (tm, tn), 1)
        diag_sum = jnp.sum(jnp.where(rg == cg, logits, 0.0), keepdims=True)
        out_ref[...] += (-2.0 * inv_b) * diag_sum

    # ---- per-row-tile finalize: add row LSE contribution ----
    @pl.when(j == nj - 1)
    def _():
        row_lse = m_row[...] + jnp.log(l_row[...])               # (TM, 1)
        out_ref[...] += jnp.sum(row_lse, keepdims=True) * inv_b

    # ---- grand finalize: add the column LSE term ----
    @pl.when(jnp.logical_and(i == ni - 1, j == nj - 1))
    def _():
        col_lse = col_m[...] + jnp.log(col_s[...])               # (NJ, 1, TN)
        out_ref[...] += jnp.sum(jnp.sum(col_lse, axis=0), axis=-1,
                                keepdims=True) * inv_b


def _pick_tile(n, max_tile):
    """Largest tile <= max_tile that divides n (multiple of 8), else n."""
    if n <= max_tile:
        return n
    t = (max_tile // 8) * 8
    while t >= 8:
        if n % t == 0:
            return t
        t -= 8
    return n  # fall back to a single monolithic tile


def clip_loss(image_features, text_features, logit_scale, *, tm=None, tn=None):
    """Pallas implementation of ClipLoss.forward. Returns a scalar f32 loss."""
    B, D = image_features.shape
    assert text_features.shape == (B, D)
    # Larger row tile amortizes the repeated HBM reads of the text features
    # (text is re-streamed once per row tile); column tile sets per-step size.
    tm = _pick_tile(B, 512) if tm is None else tm
    tn = _pick_tile(B, 256) if tn is None else tn
    assert B % tm == 0 and B % tn == 0
    assert tm == B or tm % 8 == 0
    assert tn == B or tn % 8 == 0
    ni, nj = B // tm, B // tn
    inv_b = 1.0 / B

    # exp(logit_scale) done once on the host-side XLA graph (scalar op).
    scale = jnp.exp(jnp.asarray(logit_scale, jnp.float32).reshape((1, 1)))

    itemsize = jnp.dtype(image_features.dtype).itemsize
    cost = pl.CostEstimate(
        flops=2 * B * B * D + 4 * B * B,
        transcendentals=2 * B * B + 2 * B,
        bytes_accessed=int((1 + ni) * B * D * itemsize + 8),
    )

    grid_spec = pltpu.PrefetchScalarGridSpec(
        num_scalar_prefetch=0,
        grid=(ni, nj),
        in_specs=[
            pl.BlockSpec(memory_space=pltpu.MemorySpace.SMEM),   # exp(logit_scale)
            pl.BlockSpec((tm, D), lambda i, j: (i, 0)),          # image rows
            pl.BlockSpec((tn, D), lambda i, j: (j, 0)),          # text "columns"
        ],
        out_specs=pl.BlockSpec((1, 1), lambda i, j: (0, 0)),
        scratch_shapes=[
            pltpu.VMEM((tm, 1), jnp.float32),        # m_row
            pltpu.VMEM((tm, 1), jnp.float32),        # l_row
            pltpu.VMEM((nj, 1, tn), jnp.float32),    # col_m
            pltpu.VMEM((nj, 1, tn), jnp.float32),    # col_s
        ],
    )

    out = pl.pallas_call(
        functools.partial(_clip_loss_kernel, inv_b=inv_b, tm=tm, tn=tn),
        out_shape=jax.ShapeDtypeStruct((1, 1), jnp.float32),
        grid_spec=grid_spec,
        compiler_params=pltpu.CompilerParams(
            # Column axis is the row-LSE reduction; the row axis carries the
            # shared column accumulators and the single final writeback, so it
            # cannot be megacore-"parallel" without per-core partial outputs.
            dimension_semantics=("arbitrary", "arbitrary")),
        cost_estimate=cost,
    )(scale, image_features, text_features)
    return out[0, 0]


def clip_loss_ref(image_features, text_features, logit_scale):
    """Pure-JAX reference mirroring the PyTorch module."""
    scale = jnp.exp(jnp.asarray(logit_scale, jnp.float32).reshape(()))
    logits = scale * (image_features.astype(jnp.float32)
                      @ text_features.astype(jnp.float32).T)
    labels = jnp.arange(logits.shape[0])

    def ce(lg):
        lse = jax.nn.logsumexp(lg, axis=1)
        picked = jnp.take_along_axis(lg, labels[:, None], axis=1)[:, 0]
        return jnp.mean(lse - picked)

    return ce(logits) + ce(logits.T)


if __name__ == "__main__":
    key = jax.random.PRNGKey(0)
    k1, k2, k3, k4 = jax.random.split(key, 4)

    # Deterministic parameter init (nn.Parameter(ones([]) * log(1/0.07)))
    logit_scale = jnp.full((1, 1), np.log(1.0 / 0.07), dtype=jnp.float32)

    # Small single-tile case: batch=8, hidden=32.
    B, D = 8, 32
    image_features = jax.random.normal(k1, (B, D), dtype=jnp.float32)
    text_features = jax.random.normal(k2, (B, D), dtype=jnp.float32)
    loss = jax.block_until_ready(clip_loss(image_features, text_features, logit_scale))
    ref = clip_loss_ref(image_features, text_features, logit_scale)
    np.testing.assert_allclose(np.asarray(loss), np.asarray(ref), rtol=1e-4, atol=1e-4)

    # Multi-tile case exercising the (row, col) grid + online logsumexp.
    B2, D2 = 64, 32
    img2 = jax.random.normal(k3, (B2, D2), dtype=jnp.float32)
    txt2 = jax.random.normal(k4, (B2, D2), dtype=jnp.float32)
    loss2 = jax.block_until_ready(clip_loss(img2, txt2, logit_scale, tm=32, tn=32))
    ref2 = clip_loss_ref(img2, txt2, logit_scale)
    np.testing.assert_allclose(np.asarray(loss2), np.asarray(ref2), rtol=1e-4, atol=1e-4)

    # Rectangular tiles (tm != tn): exercises the general diagonal-overlap path.
    loss3 = jax.block_until_ready(clip_loss(img2, txt2, logit_scale, tm=32, tn=16))
    np.testing.assert_allclose(np.asarray(loss3), np.asarray(ref2), rtol=1e-4, atol=1e-4)

    print("KERNEL_OK")
</pallas_src>

<mosaic_0001>
module attributes {stable_mosaic.version = 11 : i64} {
  func.func @_clip_loss_kernel(%arg0: i32, %arg1: i32, %arg2: memref<1x1xf32, #tpu.memory_space<smem>>, %arg3: memref<8x32xf32, #tpu.memory_space<vmem>>, %arg4: memref<8x32xf32, #tpu.memory_space<vmem>>, %arg5: memref<1x1xf32, #tpu.memory_space<vmem>>, %arg6: memref<8x1xf32, #tpu.memory_space<vmem>>, %arg7: memref<8x1xf32, #tpu.memory_space<vmem>>, %arg8: memref<1x1x8xf32, #tpu.memory_space<vmem>>, %arg9: memref<1x1x8xf32, #tpu.memory_space<vmem>>) attributes {dimension_semantics = [#tpu.dimension_semantics<arbitrary>, #tpu.dimension_semantics<arbitrary>], iteration_bounds = array<i64: 1, 1>, scalar_prefetch = 0 : i64, scratch_operands = 4 : i64, tpu.core_type = #tpu.core_type<tc>, window_params = [{transform_indices = @transform_0, window_bounds = array<i64: 1, 1>}, {transform_indices = @transform_1, window_bounds = array<i64: 8, 32>}, {transform_indices = @transform_2, window_bounds = array<i64: 8, 32>}, {pipeline_mode = #tpu.pipeline_mode<synchronous>, transform_indices = @transform_3, window_bounds = array<i64: 1, 1>}]} {
    %c0_i32 = arith.constant 0 : i32
    %0 = arith.cmpi eq, %arg0, %c0_i32 : i32
    %c0_i32_0 = arith.constant 0 : i32
    %1 = arith.cmpi eq, %arg1, %c0_i32_0 : i32
    %2 = arith.andi %0, %1 : i1
    %3 = arith.extui %2 : i1 to i32
    %c0_i32_1 = arith.constant 0 : i32
    %4 = arith.cmpi ne, %3, %c0_i32_1 : i32
    scf.if %4 {
      %cst_40 = arith.constant 0.000000e+00 : f32
      %76 = vector.broadcast %cst_40 : f32 to vector<1x1xf32>
      %c0_41 = arith.constant 0 : index
      %c0_42 = arith.constant 0 : index
      %77 = vector.load %arg5[%c0_41, %c0_42] : memref<1x1xf32, #tpu.memory_space<vmem>>, vector<1x1xf32>
      tpu.vector_store %arg5[%c0_41, %c0_42], %76 {strides = array<i32>} : memref<1x1xf32, #tpu.memory_space<vmem>>, vector<1x1xf32>,
    } else {
    }
    %c0_i32_2 = arith.constant 0 : i32
    %5 = arith.cmpi eq, %arg1, %c0_i32_2 : i32
    %6 = arith.extui %5 : i1 to i32
    %c0_i32_3 = arith.constant 0 : i32
    %7 = arith.cmpi ne, %6, %c0_i32_3 : i32
    scf.if %7 {
      %cst_40 = arith.constant 0xFF800000 : f32
      %76 = vector.broadcast %cst_40 : f32 to vector<8x1xf32>
      %c0_41 = arith.constant 0 : index
      %c0_42 = arith.constant 0 : index
      %77 = vector.load %arg6[%c0_41, %c0_42] : memref<8x1xf32, #tpu.memory_space<vmem>>, vector<8x1xf32>
      tpu.vector_store %arg6[%c0_41, %c0_42], %76 {strides = array<i32>} : memref<8x1xf32, #tpu.memory_space<vmem>>, vector<8x1xf32>,
      %cst_43 = arith.constant 0.000000e+00 : f32
      %78 = vector.broadcast %cst_43 : f32 to vector<8x1xf32>
      %c0_44 = arith.constant 0 : index
      %c0_45 = arith.constant 0 : index
      %79 = vector.load %arg7[%c0_44, %c0_45] : memref<8x1xf32, #tpu.memory_space<vmem>>, vector<8x1xf32>
      tpu.vector_store %arg7[%c0_44, %c0_45], %78 {strides = array<i32>} : memref<8x1xf32, #tpu.memory_space<vmem>>, vector<8x1xf32>,
    } else {
    }
    %c0_i32_4 = arith.constant 0 : i32
    %8 = arith.cmpi eq, %arg0, %c0_i32_4 : i32
    %9 = arith.extui %8 : i1 to i32
    %c0_i32_5 = arith.constant 0 : i32
    %10 = arith.cmpi ne, %9, %c0_i32_5 : i32
    scf.if %10 {
      %cst_40 = arith.constant 0xFF800000 : f32
      %76 = vector.broadcast %cst_40 : f32 to vector<1x8xf32>
      %77 = arith.index_cast %arg1 : i32 to index
      %c0_41 = arith.constant 0 : index
      %c0_42 = arith.constant 0 : index
      %78 = vector.load %arg8[%77, %c0_41, %c0_42] : memref<1x1x8xf32, #tpu.memory_space<vmem>>, vector<1x1x8xf32>
      %79 = vector.shape_cast %78 : vector<1x1x8xf32> to vector<1x8xf32>
      %80 = vector.shape_cast %76 : vector<1x8xf32> to vector<1x1x8xf32>
      tpu.vector_store %arg8[%77, %c0_41, %c0_42], %80 {strides = array<i32>} : memref<1x1x8xf32, #tpu.memory_space<vmem>>, vector<1x1x8xf32>,
      %cst_43 = arith.constant 0.000000e+00 : f32
      %81 = vector.broadcast %cst_43 : f32 to vector<1x8xf32>
      %82 = arith.index_cast %arg1 : i32 to index
      %c0_44 = arith.constant 0 : index
      %c0_45 = arith.constant 0 : index
      %83 = vector.load %arg9[%82, %c0_44, %c0_45] : memref<1x1x8xf32, #tpu.memory_space<vmem>>, vector<1x1x8xf32>
      %84 = vector.shape_cast %83 : vector<1x1x8xf32> to vector<1x8xf32>
      %85 = vector.shape_cast %81 : vector<1x8xf32> to vector<1x1x8xf32>
      tpu.vector_store %arg9[%82, %c0_44, %c0_45], %85 {strides = array<i32>} : memref<1x1x8xf32, #tpu.memory_space<vmem>>, vector<1x1x8xf32>,
    } else {
    }
    %c0 = arith.constant 0 : index
    %c0_6 = arith.constant 0 : index
    %11 = vector.load %arg3[%c0, %c0_6] : memref<8x32xf32, #tpu.memory_space<vmem>>, vector<8x32xf32>
    %c0_7 = arith.constant 0 : index
    %c0_8 = arith.constant 0 : index
    %12 = vector.load %arg4[%c0_7, %c0_8] : memref<8x32xf32, #tpu.memory_space<vmem>>, vector<8x32xf32>
    %cst = arith.constant dense<0.000000e+00> : vector<8x8xf32>
    %13 = tpu.matmul %11, %12, %cst {dimension_numbers = #tpu.dot_dimension_numbers<[1], [1], [0], [0], [0, 0, 1, 0], [], []>} : vector<8x32xf32>, vector<8x32xf32>, vector<8x8xf32> -> vector<8x8xf32>
    %c0_9 = arith.constant 0 : index
    %c0_10 = arith.constant 0 : index
    %14 = memref.load %arg2[%c0_9, %c0_10] : memref<1x1xf32, #tpu.memory_space<smem>>
    %15 = vector.broadcast %14 : f32 to vector<8x8xf32>
    %16 = arith.mulf %13, %15 : vector<8x8xf32>
    %c0_11 = arith.constant 0 : index
    %c0_12 = arith.constant 0 : index
    %17 = vector.load %arg6[%c0_11, %c0_12] : memref<8x1xf32, #tpu.memory_space<vmem>>, vector<8x1xf32>
    %cst_13 = arith.constant dense<0xFF800000> : vector<8xf32>
    %18 = vector.multi_reduction <maximumf>, %16, %cst_13 [1] : vector<8x8xf32> to vector<8xf32>
    %19 = vector.shape_cast %18 : vector<8xf32> to vector<8x1xf32>
    %20 = arith.maximumf %17, %19 : vector<8x1xf32>
    %c0_14 = arith.constant 0 : index
    %c0_15 = arith.constant 0 : index
    %21 = vector.load %arg7[%c0_14, %c0_15] : memref<8x1xf32, #tpu.memory_space<vmem>>, vector<8x1xf32>
    %22 = arith.subf %17, %20 : vector<8x1xf32>
    %23 = math.exp %22 : vector<8x1xf32>
    %24 = arith.mulf %21, %23 : vector<8x1xf32>
    %25 = vector.broadcast %20 : vector<8x1xf32> to vector<8x8xf32>
    %26 = arith.subf %16, %25 : vector<8x8xf32>
    %27 = math.exp %26 : vector<8x8xf32>
    %cst_16 = arith.constant dense<0.000000e+00> : vector<8xf32>
    %28 = vector.multi_reduction <add>, %27, %cst_16 [1] : vector<8x8xf32> to vector<8xf32>
    %29 = vector.shape_cast %28 : vector<8xf32> to vector<8x1xf32>
    %30 = arith.addf %24, %29 : vector<8x1xf32>
    %c0_17 = arith.constant 0 : index
    %c0_18 = arith.constant 0 : index
    %31 = vector.load %arg7[%c0_17, %c0_18] : memref<8x1xf32, #tpu.memory_space<vmem>>, vector<8x1xf32>
    tpu.vector_store %arg7[%c0_17, %c0_18], %30 {strides = array<i32>} : memref<8x1xf32, #tpu.memory_space<vmem>>, vector<8x1xf32>,
    %c0_19 = arith.constant 0 : index
    %c0_20 = arith.constant 0 : index
    %32 = vector.load %arg6[%c0_19, %c0_20] : memref<8x1xf32, #tpu.memory_space<vmem>>, vector<8x1xf32>
    tpu.vector_store %arg6[%c0_19, %c0_20], %20 {strides = array<i32>} : memref<8x1xf32, #tpu.memory_space<vmem>>, vector<8x1xf32>,
    %33 = arith.index_cast %arg1 : i32 to index
    %c0_21 = arith.constant 0 : index
    %c0_22 = arith.constant 0 : index
    %34 = vector.load %arg8[%33, %c0_21, %c0_22] : memref<1x1x8xf32, #tpu.memory_space<vmem>>, vector<1x1x8xf32>
    %35 = vector.shape_cast %34 : vector<1x1x8xf32> to vector<1x8xf32>
    %36 = arith.index_cast %arg1 : i32 to index
    %c0_23 = arith.constant 0 : index
    %c0_24 = arith.constant 0 : index
    %37 = vector.load %arg9[%36, %c0_23, %c0_24] : memref<1x1x8xf32, #tpu.memory_space<vmem>>, vector<1x1x8xf32>
    %38 = vector.shape_cast %37 : vector<1x1x8xf32> to vector<1x8xf32>
    %cst_25 = arith.constant dense<0xFF800000> : vector<8xf32>
    %39 = vector.multi_reduction <maximumf>, %16, %cst_25 [0] : vector<8x8xf32> to vector<8xf32>
    %40 = vector.shape_cast %39 : vector<8xf32> to vector<1x8xf32>
    %41 = arith.maximumf %35, %40 : vector<1x8xf32>
    %42 = arith.subf %35, %41 : vector<1x8xf32>
    %43 = math.exp %42 : vector<1x8xf32>
    %44 = arith.mulf %38, %43 : vector<1x8xf32>
    %45 = vector.broadcast %41 : vector<1x8xf32> to vector<8x8xf32>
    %46 = arith.subf %16, %45 : vector<8x8xf32>
    %47 = math.exp %46 : vector<8x8xf32>
    %cst_26 = arith.constant dense<0.000000e+00> : vector<8xf32>
    %48 = vector.multi_reduction <add>, %47, %cst_26 [0] : vector<8x8xf32> to vector<8xf32>
    %49 = vector.shape_cast %48 : vector<8xf32> to vector<1x8xf32>
    %50 = arith.addf %44, %49 : vector<1x8xf32>
    %51 = arith.index_cast %arg1 : i32 to index
    %c0_27 = arith.constant 0 : index
    %c0_28 = arith.constant 0 : index
    %52 = vector.load %arg9[%51, %c0_27, %c0_28] : memref<1x1x8xf32, #tpu.memory_space<vmem>>, vector<1x1x8xf32>
    %53 = vector.shape_cast %52 : vector<1x1x8xf32> to vector<1x8xf32>
    %54 = vector.shape_cast %50 : vector<1x8xf32> to vector<1x1x8xf32>
    tpu.vector_store %arg9[%51, %c0_27, %c0_28], %54 {strides = array<i32>} : memref<1x1x8xf32, #tpu.memory_space<vmem>>, vector<1x1x8xf32>,
    %55 = arith.index_cast %arg1 : i32 to index
    %c0_29 = arith.constant 0 : index
    %c0_30 = arith.constant 0 : index
    %56 = vector.load %arg8[%55, %c0_29, %c0_30] : memref<1x1x8xf32, #tpu.memory_space<vmem>>, vector<1x1x8xf32>
    %57 = vector.shape_cast %56 : vector<1x1x8xf32> to vector<1x8xf32>
    %58 = vector.shape_cast %41 : vector<1x8xf32> to vector<1x1x8xf32>
    tpu.vector_store %arg8[%55, %c0_29, %c0_30], %58 {strides = array<i32>} : memref<1x1x8xf32, #tpu.memory_space<vmem>>, vector<1x1x8xf32>,
    %c8_i32 = arith.constant 8 : i32
    %59 = arith.muli %arg0, %c8_i32 : i32
    %c8_i32_31 = arith.constant 8 : i32
    %60 = arith.muli %arg1, %c8_i32_31 : i32
    %c8_i32_32 = arith.constant 8 : i32
    %61 = arith.addi %60, %c8_i32_32 : i32
    %62 = arith.cmpi slt, %59, %61 : i32
    %c8_i32_33 = arith.constant 8 : i32
    %63 = arith.addi %59, %c8_i32_33 : i32
    %64 = arith.cmpi slt, %60, %63 : i32
    %65 = arith.andi %62, %64 : i1
    %66 = arith.extui %65 : i1 to i32
    %c0_i32_34 = arith.constant 0 : i32
    %67 = arith.cmpi ne, %66, %c0_i32_34 : i32
    scf.if %67 {
      %76 = tpu.iota {dimensions = array<i32: 0>} : vector<8x8xi32>
      %77 = vector.broadcast %59 : i32 to vector<8x8xi32>
      %78 = arith.addi %77, %76 : vector<8x8xi32>
      %79 = tpu.iota {dimensions = array<i32: 1>} : vector<8x8xi32>
      %80 = vector.broadcast %60 : i32 to vector<8x8xi32>
      %81 = arith.addi %80, %79 : vector<8x8xi32>
      %82 = arith.cmpi eq, %78, %81 : vector<8x8xi32>
      %cst_40 = arith.constant 0.000000e+00 : f32
      %83 = vector.broadcast %cst_40 : f32 to vector<8x8xf32>
      %84 = arith.select %82, %16, %83 : vector<8x8xi1>, vector<8x8xf32>
      %85 = vector.shape_cast %84 : vector<8x8xf32> to vector<1x8x8xf32>
      %cst_41 = arith.constant dense<0.000000e+00> : vector<1xf32>
      %86 = vector.multi_reduction <add>, %85, %cst_41 [1, 2] : vector<1x8x8xf32> to vector<1xf32>
      %87 = vector.shape_cast %86 : vector<1xf32> to vector<1x1x1xf32>
      %88 = vector.extract %87[0, 0, 0] : f32 from vector<1x1x1xf32>
      %89 = vector.broadcast %88 : f32 to vector<1x1xf32>
      %c0_42 = arith.constant 0 : index
      %c0_43 = arith.constant 0 : index
      %90 = vector.load %arg5[%c0_42, %c0_43] : memref<1x1xf32, #tpu.memory_space<vmem>>, vector<1x1xf32>
      %cst_44 = arith.constant -2.500000e-01 : f32
      %91 = vector.broadcast %cst_44 : f32 to vector<1x1xf32>
      %92 = arith.mulf %91, %89 : vector<1x1xf32>
      %93 = arith.addf %90, %92 : vector<1x1xf32>
      %c0_45 = arith.constant 0 : index
      %c0_46 = arith.constant 0 : index
      %94 = vector.load %arg5[%c0_45, %c0_46] : memref<1x1xf32, #tpu.memory_space<vmem>>, vector<1x1xf32>
      tpu.vector_store %arg5[%c0_45, %c0_46], %93 {strides = array<i32>} : memref<1x1xf32, #tpu.memory_space<vmem>>, vector<1x1xf32>,
    } else {
    }
    %c0_i32_35 = arith.constant 0 : i32
    %68 = arith.cmpi eq, %arg1, %c0_i32_35 : i32
    %69 = arith.extui %68 : i1 to i32
    %c0_i32_36 = arith.constant 0 : i32
    %70 = arith.cmpi ne, %69, %c0_i32_36 : i32
    scf.if %70 {
      %c0_40 = arith.constant 0 : index
      %c0_41 = arith.constant 0 : index
      %76 = vector.load %arg6[%c0_40, %c0_41] : memref<8x1xf32, #tpu.memory_space<vmem>>, vector<8x1xf32>
      %c0_42 = arith.constant 0 : index
      %c0_43 = arith.constant 0 : index
      %77 = vector.load %arg7[%c0_42, %c0_43] : memref<8x1xf32, #tpu.memory_space<vmem>>, vector<8x1xf32>
      %78 = math.log %77 : vector<8x1xf32>
      %79 = arith.addf %76, %78 : vector<8x1xf32>
      %c0_44 = arith.constant 0 : index
      %c0_45 = arith.constant 0 : index
      %80 = vector.load %arg5[%c0_44, %c0_45] : memref<1x1xf32, #tpu.memory_space<vmem>>, vector<1x1xf32>
      %81 = vector.shape_cast %79 : vector<8x1xf32> to vector<1x8x1xf32>
      %cst_46 = arith.constant dense<0.000000e+00> : vector<1xf32>
      %82 = vector.multi_reduction <add>, %81, %cst_46 [1, 2] : vector<1x8x1xf32> to vector<1xf32>
      %83 = vector.shape_cast %82 : vector<1xf32> to vector<1x1x1xf32>
      %84 = vector.extract %83[0, 0, 0] : f32 from vector<1x1x1xf32>
      %85 = vector.broadcast %84 : f32 to vector<1x1xf32>
      %cst_47 = arith.constant 1.250000e-01 : f32
      %86 = vector.broadcast %cst_47 : f32 to vector<1x1xf32>
      %87 = arith.mulf %85, %86 : vector<1x1xf32>
      %88 = arith.addf %80, %87 : vector<1x1xf32>
      %c0_48 = arith.constant 0 : index
      %c0_49 = arith.constant 0 : index
      %89 = vector.load %arg5[%c0_48, %c0_49] : memref<1x1xf32, #tpu.memory_space<vmem>>, vector<1x1xf32>
      tpu.vector_store %arg5[%c0_48, %c0_49], %88 {strides = array<i32>} : memref<1x1xf32, #tpu.memory_space<vmem>>, vector<1x1xf32>,
    } else {
    }
    %c0_i32_37 = arith.constant 0 : i32
    %71 = arith.cmpi eq, %arg0, %c0_i32_37 : i32
    %c0_i32_38 = arith.constant 0 : i32
    %72 = arith.cmpi eq, %arg1, %c0_i32_38 : i32
    %73 = arith.andi %71, %72 : i1
    %74 = arith.extui %73 : i1 to i32
    %c0_i32_39 = arith.constant 0 : i32
    %75 = arith.cmpi ne, %74, %c0_i32_39 : i32
    scf.if %75 {
      %c0_40 = arith.constant 0 : index
      %c0_41 = arith.constant 0 : index
      %c0_42 = arith.constant 0 : index
      %76 = vector.load %arg8[%c0_40, %c0_41, %c0_42] : memref<1x1x8xf32, #tpu.memory_space<vmem>>, vector<1x1x8xf32>
      %c0_43 = arith.constant 0 : index
      %c0_44 = arith.constant 0 : index
      %c0_45 = arith.constant 0 : index
      %77 = vector.load %arg9[%c0_43, %c0_44, %c0_45] : memref<1x1x8xf32, #tpu.memory_space<vmem>>, vector<1x1x8xf32>
      %78 = math.log %77 : vector<1x1x8xf32>
      %79 = arith.addf %76, %78 : vector<1x1x8xf32>
      %c0_46 = arith.constant 0 : index
      %c0_47 = arith.constant 0 : index
      %80 = vector.load %arg5[%c0_46, %c0_47] : memref<1x1xf32, #tpu.memory_space<vmem>>, vector<1x1xf32>
      %cst_48 = arith.constant dense<0.000000e+00> : vector<1x8xf32>
      %81 = vector.multi_reduction <add>, %79, %cst_48 [0] : vector<1x1x8xf32> to vector<1x8xf32>
      %cst_49 = arith.constant dense<0.000000e+00> : vector<1xf32>
      %82 = vector.multi_reduction <add>, %81, %cst_49 [1] : vector<1x8xf32> to vector<1xf32>
      %83 = vector.shape_cast %82 : vector<1xf32> to vector<1x1xf32>
      %cst_50 = arith.constant 1.250000e-01 : f32
      %84 = vector.broadcast %cst_50 : f32 to vector<1x1xf32>
      %85 = arith.mulf %83, %84 : vector<1x1xf32>
      %86 = arith.addf %80, %85 : vector<1x1xf32>
      %c0_51 = arith.constant 0 : index
      %c0_52 = arith.constant 0 : index
      %87 = vector.load %arg5[%c0_51, %c0_52] : memref<1x1xf32, #tpu.memory_space<vmem>>, vector<1x1xf32>
      tpu.vector_store %arg5[%c0_51, %c0_52], %86 {strides = array<i32>} : memref<1x1xf32, #tpu.memory_space<vmem>>, vector<1x1xf32>,
    } else {
    }
    return
  }
  func.func @transform_0(%arg0: i32, %arg1: i32) -> (i32, i32) {
    %c0_i32 = arith.constant 0 : i32
    %c0_i32_0 = arith.constant 0 : i32
    %c0_i32_1 = arith.constant 0 : i32
    return %c0_i32, %c0_i32_0 : i32, i32
  }
  func.func @transform_1(%arg0: i32, %arg1: i32) -> (i32, i32) {
    %c0_i32 = arith.constant 0 : i32
    %c0_i32_0 = arith.constant 0 : i32
    return %arg0, %c0_i32 : i32, i32
  }
  func.func @transform_2(%arg0: i32, %arg1: i32) -> (i32, i32) {
    %c0_i32 = arith.constant 0 : i32
    %c0_i32_0 = arith.constant 0 : i32
    return %arg1, %c0_i32 : i32, i32
  }
  func.func @transform_3(%arg0: i32, %arg1: i32) -> (i32, i32) {
    %c0_i32 = arith.constant 0 : i32
    %c0_i32_0 = arith.constant 0 : i32
    %c0_i32_1 = arith.constant 0 : i32
    return %c0_i32, %c0_i32_0 : i32, i32
  }
}

</mosaic_0001>

<bundles_post_ra>
// kernel: tpu_custom_call.1
= control target key start
LH: loop header
LB: loop body
LE: loop exit
PB: predicated region body
PF: predicated region fallthrough
CT: control target
= control target key end

     0   :  { %9 = vsyncpa [#allocation8], 0  ;;  %s408_s0 = inlined_call_operand.<no memory space> [shape: f32[1,1], index: 0, kind: input, shape index: {}]   ;;  %s409_s1 = inlined_call_operand.hbm [shape: f32[8,32], index: 1, kind: input, shape index: {}]   ;;  %s410_s2 = inlined_call_operand.hbm [shape: f32[8,32], index: 2, kind: input, shape index: {}]   ;;  %s411_s3 = inlined_call_operand.hbm [shape: f32[1,1], index: 3, kind: output, shape index: {}]  }
   0x1   :  { %10 = vsyncpa [#allocation11], 0 }
   0x2   :  { %11 = vsyncpa [#allocation9], 0  ;;  %s19_s14 = sshll.u32 %s409_s1, 4  ;;  %s349_s15 = smov [#allocation7]   ;;  %s20_s14 = int_to_ptr.hbm [resolvable:$true] %s19_s14 }
   0x3   :  { %s21_s16 = sshll.u32 %s349_s15, 4  ;;  %s30_s19 = sshll.u32 %s410_s2, 4  ;;  %s22_s16 = int_to_ptr.vmem [resolvable:$true] %s21_s16  ;;  %s31_s19 = int_to_ptr.hbm [resolvable:$true] %s30_s19 }
   0x4   :  { %24 = dma.hbm_to_vmem [thread:$0]  %s20_s14, 128, %s22_s16, [#allocation8]  }
   0x5   :  { %s350_s20 = smov [#allocation10]  }
   0x6   :  { %s32_s21 = sshll.u32 %s350_s20, 4  ;;  %s33_s21 = int_to_ptr.vmem [resolvable:$true] %s32_s21 }
   0x7   :  { %35 = dma.hbm_to_vmem [thread:$0]  %s31_s19, 128, %s33_s21, [#allocation11]  }
   0x8   :  { %343 = dma.done.wait [#allocation8], 128  }
   0x9   :  { %344 = vsyncadd [#allocation8], 4294967168 }
   0xa   :  { %345 = dma.done.wait [#allocation11], 128  }
   0xb   :  { %346 = vsyncadd [#allocation11], 4294967168  ;;  %vm66_vm0 = vcmask 261120   ;;  %v65_v0 = vld [vmem:[#allocation10] sm:$0xff]  ;;  %v64_v1 = vld [vmem:[#allocation7] sm:$0xff]  ;;  %vm61_vm1 = vcmask 57344   ;;  %v94_v4 = vstv %s408_s0  ;;  %v162_v41 = vlaneseq }
   0xc   :  { %246 = vmatpush.xpose.msk.msra.mxu0 %vm66_vm0, %v65_v0  ;;  %v351_v2 = vmov -inf   ;;  %vm55_vm2 = vcmask 7168   ;;  %v352_v3 = vmov 0.0   ;;  %vm97_vm3 = vcmask 64512   ;;  %s354_s23 = smov [#allocation12]   ;;  %s235_s27 = sshll.u32 %s411_s3, 4  ;;  %s236_s27 = int_to_ptr.hbm [resolvable:$true] %s235_s27 }
   0xd   :  { %62 = vst.msk [vmem:[#allocation4] sm:$0x1] %vm61_vm1, %v351_v2  ;;  %v353_v33 = vmov 0   ;;  %v163_v42 = vshrl.u32 %v162_v41, 7  ;;  %v167_v43 = vand.u32 127, %v162_v41  ;;  %vm50_vm5 = vcmask 0  }
   0xe   :  { %56 = vst.msk [vmem:[#allocation2] sm:$0xff] %vm55_vm2, %v351_v2  ;;  %258 = vset.pattern.permute.xlu0 %v353_v33  ;;  %s233_s24 = sshll.u32 %s354_s23, 4  ;;  %s234_s24 = int_to_ptr.vmem [resolvable:$true] %s233_s24 }
   0xf   :  { %247 = vmatmul.msk.f32.vlgmr.msra.gmra.mxu0 %vm66_vm0, %v64_v1  ;;  %57 = vst.msk [vmem:[#allocation3] sm:$0xff] %vm55_vm2, %v352_v3  ;;  %vm170_vm4 = vcmp.eq.s32.totalorder %v163_v42, %v167_v43 }
  0x10   :  { %63 = vst.msk [vmem:[#allocation5] sm:$0x1] %vm61_vm1, %v352_v3 }
  0x11   :  { %51 = vst.msk [vmem:[#allocation12] sm:$0x1] %vm50_vm5, %v352_v3 }
  0x14   :  { %v122_v13 = vld [vmem:[#allocation4] sm:$0x1] }
  0x15   :  { %v96_v34 = vld [vmem:[#allocation2] sm:$0xff] }
  0x16   :  { %v102_v50 = vld [vmem:[#allocation3] sm:$0xff] }
  0x17   :  { %v123_v28 = vld [vmem:[#allocation5] sm:$0x1] }
  0x8c   :  { %v90_v5 = vpop.f32.mrf.mxu0 }
  0x8d   :  { %v95_v6 = vmul.f32 %v94_v4, %v90_v5 }
  0x8f   :  { %v98_v7 = vsel %vm97_vm3, %v95_v6, -inf  ;;  %v171_v46 = vsel %vm170_vm4, %v95_v6, 0.0 }
  0x90   :  { %99 = vmax.xlane.f32.xlu0 %v98_v7  ;;  %v124_v8 = vrot.slane %v98_v7, 4  ;;  %v172_v47 = vsel %vm97_vm3, %v171_v46, 0.0 }
  0x92   :  { %v125_v9 = vmax.f32 %v98_v7, %v124_v8 }
  0x94   :  { %v126_v10 = vrot.slane %v125_v9, 2 }
  0x96   :  { %v127_v11 = vmax.f32 %v125_v9, %v126_v10  ;;  %v183_v10 = vld [vmem:[#allocation12] sm:$0x1] }
  0x98   :  { %v128_v12 = vrot.slane %v127_v11, 1 }
  0x9a   :  { %v129_v14 = vmax.f32 %v127_v11, %v128_v12 }
  0x9c   :  { %v130_v15 = vmax.f32 %v122_v13, %v129_v14 }
  0x9e   :  { %v136_v16 = vperm.slane %v130_v15, 0  ;;  %151 = vst.msk [vmem:[#allocation4] sm:$0x1] %vm61_vm1, %v130_v15  ;;  %v131_v19 = vsub.f32 %v122_v13, %v130_v15 }
  0xa0   :  { %v138_v17 = vsub.f32 %v95_v6, %v136_v16  ;;  %v132_v20 = vmul.f32 1.442695, %v131_v19 }
  0xa2   :  { %v139_v18 = vmul.f32 1.442695, %v138_v17 }
  0xa4   :  { %259 = vpow2.f32 %v139_v18 }
  0xa5   :  { %261 = vpow2.f32 %v132_v20 }
  0xaa   :  { %v260_v21 = vpop.eup %259 }
  0xab   :  { %v141_v22 = vsel %vm97_vm3, %v260_v21, 0.0  ;;  %v262_v27 = vpop.eup %261 }
  0xac   :  { %v142_v23 = vrot.slane %v141_v22, 4  ;;  %v134_v30 = vmul.f32 %v262_v27, %v123_v28 }
  0xae   :  { %v143_v24 = vadd.f32 %v142_v23, %v141_v22 }
  0xb0   :  { %v144_v25 = vrot.slane %v143_v24, 2 }
  0xb2   :  { %v145_v26 = vadd.f32 %v144_v25, %v143_v24 }
  0xb4   :  { %v146_v29 = vrot.slane %v145_v26, 1 }
  0xb6   :  { %v147_v31 = vadd.f32 %v146_v29, %v145_v26 }
  0xb8   :  { %v148_v32 = vadd.f32 %v147_v31, %v134_v30 }
  0xba   :  { %150 = vst.msk [vmem:[#allocation5] sm:$0x1] %vm61_vm1, %v148_v32 }
  0xc1   :  { %v215_v57 = vld [vmem:[#allocation5] sm:$0x1] }
 0x103   :  { %v100_v35 = vpop.xlane.xlu0 %99 }
 0x104   :  { %v101_v36 = vmax.f32 %v96_v34, %v100_v35 }
 0x106   :  { %v103_v37 = vsub.f32 %v96_v34, %v101_v36  ;;  %121 = vst.msk [vmem:[#allocation2] sm:$0xff] %vm55_vm2, %v101_v36  ;;  %109 = vperm.xlu0 %258, %v101_v36  }
 0x108   :  { %v104_v48 = vmul.f32 1.442695, %v103_v37 }
 0x10d   :  { %v191_v2 = vld [vmem:[#allocation2] sm:$0xff] }
 0x178   :  { %v110_v38 = vpop.permute.xlu0 %109 }
 0x179   :  { %v112_v39 = vsub.f32 %v95_v6, %v110_v38  ;;  %v214_v6 = vld [vmem:[#allocation4] sm:$0x1] }
 0x17b   :  { %v113_v40 = vmul.f32 1.442695, %v112_v39 }
 0x17d   :  { %263 = vpow2.f32 %v113_v40 }
 0x17e   :  { %265 = vpow2.f32 %v104_v48 }
 0x183   :  { %v264_v44 = vpop.eup %263 }
 0x184   :  { %v115_v45 = vsel %vm97_vm3, %v264_v44, 0.0  ;;  %v266_v49 = vpop.eup %265 }
 0x185   :  { %116 = vadd.xlane.f32.xlu1 %v115_v45  ;;  %v106_v51 = vmul.f32 %v266_v49, %v102_v50 }
 0x18d   :  { %173 = vadd.xlane.f32.xlu1 %v172_v47 }
 0x1f8   :  { %v117_v52 = vpop.xlane.xlu1 %116 }
 0x1f9   :  { %v118_v53 = vadd.f32 %v117_v52, %v106_v51 }
 0x1fb   :  { %120 = vst.msk [vmem:[#allocation3] sm:$0xff] %vm55_vm2, %v118_v53 }
 0x200   :  { %v174_v54 = vpop.xlane.xlu1 %173 }
 0x201   :  { %v175_v55 = vrot.slane %v174_v54, 4 }
 0x202   :  { %v192_v56 = vld [vmem:[#allocation3] sm:$0xff] }
 0x203   :  { %v176_v58 = vadd.f32 %v175_v55, %v174_v54  ;;  %267 = vlog2.f32 %v192_v56 }
 0x204   :  { %269 = vlog2.f32 %v215_v57 }
 0x205   :  { %v177_v59 = vrot.slane %v176_v58, 2 }
 0x207   :  { %v178_v60 = vadd.f32 %v177_v59, %v176_v58 }
 0x209   :  { %v268_v61 = vpop.eup %267  ;;  %v179_v62 = vrot.slane %v178_v60, 1 }
 0x20a   :  { %v194_v63 = vmul.f32 0.6931472, %v268_v61  ;;  %v270_v0 = vpop.eup %269 }
 0x20b   :  { %v180_v1 = vadd.f32 %v179_v62, %v178_v60  ;;  %v217_v5 = vmul.f32 0.6931472, %v270_v0 }
 0x20c   :  { %v195_v4 = vadd.f32 %v194_v63, %v191_v2 }
 0x20d   :  { %248 = vpush %v180_v1  ;;  %v218_v7 = vadd.f32 %v217_v5, %v214_v6 }
 0x20e   :  { %v197_v3 = vsel %vm55_vm2, %v195_v4, 0.0 }
 0x20f   :  { %198 = vadd.xlane.f32.xlu2 %v197_v3  ;;  %v221_v8 = vsel %vm61_vm1, %v218_v7, 0.0 }
 0x217   :  { %222 = vadd.xlane.f32.xlu2 %v221_v8 }
 0x23e   :  { %s249_s0 = spop %248 }
 0x23f   :  { %v182_v9 = vstv %s249_s0 }
 0x240   :  { %v184_v11 = vmul.f32 -0.25, %v182_v9 }
 0x242   :  { %v185_v12 = vadd.f32 %v184_v11, %v183_v10 }
 0x244   :  { %187 = vst.msk [vmem:[#allocation12] sm:$0x1] %vm50_vm5, %v185_v12 }
 0x24b   :  { %v196_v22 = vld [vmem:[#allocation12] sm:$0x1] }
 0x282   :  { %v199_v13 = vpop.xlane.xlu2 %198 }
 0x283   :  { %v200_v14 = vrot.slane %v199_v13, 4 }
 0x285   :  { %v201_v15 = vadd.f32 %v200_v14, %v199_v13 }
 0x287   :  { %v202_v16 = vrot.slane %v201_v15, 2 }
 0x289   :  { %v203_v17 = vadd.f32 %v202_v16, %v201_v15 }
 0x28a   :  { %v223_v24 = vpop.xlane.xlu2 %222 }
 0x28b   :  { %v204_v18 = vrot.slane %v203_v17, 1  ;;  %v224_v25 = vmul.f32 0.125, %v223_v24 }
 0x28d   :  { %v205_v19 = vadd.f32 %v204_v18, %v203_v17 }
 0x28f   :  { %250 = vpush %v205_v19 }
 0x2c0   :  { %s251_s22 = spop %250 }
 0x2c1   :  { %v207_v20 = vstv %s251_s22 }
 0x2c2   :  { %v208_v21 = vmul.f32 0.125, %v207_v20 }
 0x2c4   :  { %v209_v23 = vadd.f32 %v208_v21, %v196_v22 }
 0x2c6   :  { %211 = vst.msk [vmem:[#allocation12] sm:$0x1] %vm50_vm5, %v209_v23 }
 0x2cd   :  { %v219_v26 = vld [vmem:[#allocation12] sm:$0x1] }
 0x2ce   :  { %v225_v27 = vadd.f32 %v224_v25, %v219_v26 }
 0x2d0   :  { %227 = vst.msk [vmem:[#allocation12] sm:$0x1] %vm50_vm5, %v225_v27 }
 0x2d1   :  { %238 = dma.vmem_to_hbm [thread:$0]  %s234_s24, 16, %s236_s27, [#allocation9]  }
 0x2d2   :  { %347 = dma.done.wait [#allocation9], 16  }
 0x2d3   :  { %348 = vsyncadd [#allocation9], 4294967280 }
 0x2d4   :  { %243 = vsyncpa [#allocation8], 1 }
 0x2d5   :  { %244 = vsyncpa [#allocation11], 1 }
 0x2d6   :  { %245 = vsyncpa [#allocation9], 1 }

</bundles_post_ra>
